<compile_context>
chip_gen: v5e
topology: v5e:2x2
jax: 0.10.0
libtpu: 0.0.40
codegen_flags: <defaults>
</compile_context>

<pallas_src>
import functools

import jax
import jax.numpy as jnp
from jax.experimental import pallas as pl
from jax.experimental.pallas import tpu as pltpu

LN_EPS = 1e-5  # PyTorch nn.LayerNorm default


def _round_up(x, m):
    return (x + m - 1) // m * m


def ffn_kernel(x_ref, w1_ref, b1_ref, w2_ref, b2_ref, g_ref, beta_ref,
               o_ref, acc_ref):
    # Grid: (row tiles [parallel], hidden-dim chunks [arbitrary / reduction]).
    k = pl.program_id(1)

    @pl.when(k == 0)
    def _():
        acc_ref[...] = jnp.zeros_like(acc_ref)

    # bf16 MXU inputs, f32 accumulation.
    x_bf = x_ref[...].astype(jnp.bfloat16)
    h = jnp.dot(x_bf, w1_ref[...], preferred_element_type=jnp.float32)
    h = jnp.maximum(h + b1_ref[...], 0.0)                       # ReLU, f32
    acc_ref[...] += jnp.dot(h.astype(jnp.bfloat16), w2_ref[...],
                            preferred_element_type=jnp.float32)

    @pl.when(k == pl.num_programs(1) - 1)
    def _():
        # residual + LayerNorm (biased variance, like PyTorch) in f32.
        z = acc_ref[...] + b2_ref[...] + x_ref[...].astype(jnp.float32)
        mean = jnp.mean(z, axis=-1, keepdims=True)
        var = jnp.mean((z - mean) * (z - mean), axis=-1, keepdims=True)
        normed = (z - mean) * jax.lax.rsqrt(var + LN_EPS)
        o_ref[...] = (normed * g_ref[...] + beta_ref[...]).astype(o_ref.dtype)


@functools.partial(jax.jit, static_argnames=("tile_rows", "tile_hid"))
def positionwise_ffn(x, w1, b1, w2, b2, gamma, beta, *,
                     tile_rows=512, tile_hid=2048):
    """x: [B, L, d_in];  w1: [d_hid, d_in];  w2: [d_in, d_hid]."""
    B, L, d_in = x.shape
    d_hid = w1.shape[0]
    rows = B * L

    # Row tile: large (default 512) for MXU utilization, clamped for tiny inputs,
    # always a multiple of 8 (sublane).  Rows are zero-padded to a multiple of it.
    tr = max(8, min(_round_up(tile_rows, 8), _round_up(rows, 8)))
    padded_rows = _round_up(rows, tr)

    # Hidden-dim tiling: keep the whole d_hid resident when it fits, otherwise
    # split into lane-aligned chunks and zero-pad (zero W1 cols / b1 / W2 rows
    # contribute exactly 0 after ReLU, so padding is semantics-preserving).
    if d_hid <= tile_hid:
        tk, padded_hid = d_hid, d_hid
    else:
        tk = _round_up(tile_hid, 128)
        padded_hid = _round_up(d_hid, tk)

    x2 = x.reshape(rows, d_in)
    if padded_rows != rows:
        x2 = jnp.pad(x2, ((0, padded_rows - rows), (0, 0)))

    # bf16 weights for the MXU; biases / LN params stay f32.
    w1t = w1.T.astype(jnp.bfloat16)               # (d_in, d_hid)
    w2t = w2.T.astype(jnp.bfloat16)               # (d_hid, d_in)
    b1r = b1.reshape(1, d_hid).astype(jnp.float32)
    if padded_hid != d_hid:
        w1t = jnp.pad(w1t, ((0, 0), (0, padded_hid - d_hid)))
        w2t = jnp.pad(w2t, ((0, padded_hid - d_hid), (0, 0)))
        b1r = jnp.pad(b1r, ((0, 0), (0, padded_hid - d_hid)))
    b2r = b2.reshape(1, d_in).astype(jnp.float32)
    g = gamma.reshape(1, d_in).astype(jnp.float32)
    bta = beta.reshape(1, d_in).astype(jnp.float32)

    n_row_tiles = padded_rows // tr
    n_k_tiles = padded_hid // tk
    grid = (n_row_tiles, n_k_tiles)

    # VMEM budget: double-buffered x/out tiles + double-buffered bf16 weight
    # chunks + f32 accumulator scratch + hidden-activation temporary.  Raise the
    # scoped limit above the 16/32 MiB defaults but stay under v7x's 64 MiB.
    xb = x.dtype.itemsize
    vmem_est = (
        2 * tr * d_in * xb            # x tiles (double buffered)
        + 2 * tr * d_in * xb          # out tiles
        + 2 * d_in * tk * 2           # W1^T chunk (bf16)
        + 2 * tk * d_in * 2           # W2^T chunk (bf16)
        + tr * d_in * 4               # acc scratch
        + tr * tk * 4                 # hidden activation temporary
        + 2 * (tk + 3 * d_in) * 4     # biases / LN params
    )
    vmem_limit = int(min(64 * 2**20, max(32 * 2**20, 2 * vmem_est)))

    flops = 4 * padded_rows * d_in * padded_hid          # two matmuls
    bytes_accessed = (padded_rows * d_in * xb * 2        # x in + out
                      + n_row_tiles * 2 * padded_hid * d_in * 2  # weight streams
                      + (padded_hid + 3 * d_in) * 4)

    out = pl.pallas_call(
        ffn_kernel,
        out_shape=jax.ShapeDtypeStruct((padded_rows, d_in), x.dtype),
        grid_spec=pltpu.PrefetchScalarGridSpec(
            num_scalar_prefetch=0,
            grid=grid,
            in_specs=[
                pl.BlockSpec((tr, d_in), lambda i, k: (i, 0)),   # x rows (resident across k)
                pl.BlockSpec((d_in, tk), lambda i, k: (0, k)),   # W1^T chunk
                pl.BlockSpec((1, tk), lambda i, k: (0, k)),      # b1 chunk
                pl.BlockSpec((tk, d_in), lambda i, k: (k, 0)),   # W2^T chunk
                pl.BlockSpec((1, d_in), lambda i, k: (0, 0)),    # b2
                pl.BlockSpec((1, d_in), lambda i, k: (0, 0)),    # gamma
                pl.BlockSpec((1, d_in), lambda i, k: (0, 0)),    # beta
            ],
            out_specs=pl.BlockSpec((tr, d_in), lambda i, k: (i, 0)),
            scratch_shapes=[pltpu.VMEM((tr, d_in), jnp.float32)],
        ),
        compiler_params=pltpu.CompilerParams(
            dimension_semantics=("parallel", "arbitrary"),
            vmem_limit_bytes=vmem_limit,
        ),
        cost_estimate=pl.CostEstimate(
            flops=flops,
            transcendentals=padded_rows,
            bytes_accessed=bytes_accessed,
        ),
    )(x2, w1t, b1r, w2t, b2r, g, bta)

    return out[:rows].reshape(B, L, d_in)


if __name__ == "__main__":
    # Small shapes consistent with the module: x [batch, len_q, d_model]
    B, L, d_in, d_hid = 2, 8, 32, 64

    key = jax.random.PRNGKey(0)
    kx, k1, kb1, k2, kb2, kg, kb = jax.random.split(key, 7)

    x = jax.random.normal(kx, (B, L, d_in), dtype=jnp.float32)
    # Conv1d(d_in, d_hid, 1) weight is [d_hid, d_in, 1] -> squeeze kernel dim.
    w1 = jax.random.normal(k1, (d_hid, d_in), dtype=jnp.float32) * 0.1
    b1 = jax.random.normal(kb1, (d_hid,), dtype=jnp.float32) * 0.1
    w2 = jax.random.normal(k2, (d_in, d_hid), dtype=jnp.float32) * 0.1
    b2 = jax.random.normal(kb2, (d_in,), dtype=jnp.float32) * 0.1
    gamma = 1.0 + 0.05 * jax.random.normal(kg, (d_in,), dtype=jnp.float32)
    beta = 0.05 * jax.random.normal(kb, (d_in,), dtype=jnp.float32)

    out = positionwise_ffn(x, w1, b1, w2, b2, gamma, beta)
    jax.block_until_ready(out)

    # Pure-JAX reference mirroring the kernel's bf16-matmul / f32-LN numerics.
    def ref_bf16(x):
        xr = x.reshape(-1, d_in)
        h = jnp.dot(xr.astype(jnp.bfloat16), w1.T.astype(jnp.bfloat16),
                    preferred_element_type=jnp.float32) + b1
        h = jnp.maximum(h, 0.0)
        y = jnp.dot(h.astype(jnp.bfloat16), w2.T.astype(jnp.bfloat16),
                    preferred_element_type=jnp.float32) + b2
        z = y.reshape(B, L, d_in) + x
        mu = jnp.mean(z, axis=-1, keepdims=True)
        var = jnp.mean((z - mu) ** 2, axis=-1, keepdims=True)
        return (z - mu) * jax.lax.rsqrt(var + LN_EPS) * gamma + beta

    # Full-f32 reference (module semantics); bf16 matmuls introduce ~1e-3 noise.
    def ref_f32(x):
        h = jnp.maximum(jnp.einsum("bld,hd->blh", x, w1) + b1, 0.0)
        y = jnp.einsum("blh,dh->bld", h, w2) + b2
        z = y + x
        mu = jnp.mean(z, axis=-1, keepdims=True)
        var = jnp.mean((z - mu) ** 2, axis=-1, keepdims=True)
        return (z - mu) * jax.lax.rsqrt(var + LN_EPS) * gamma + beta

    assert out.shape == (B, L, d_in)
    assert jnp.allclose(out, ref_bf16(x), atol=2e-2, rtol=2e-2)
    assert jnp.allclose(out, ref_f32(x), atol=5e-2, rtol=5e-2)

    print("KERNEL_OK")
</pallas_src>

<mosaic_0001>
module attributes {stable_mosaic.version = 11 : i64} {
  func.func @ffn_kernel(%arg0: i32, %arg1: i32, %arg2: memref<16x32xf32, #tpu.memory_space<vmem>>, %arg3: memref<32x64xbf16, #tpu.memory_space<vmem>>, %arg4: memref<1x64xf32, #tpu.memory_space<vmem>>, %arg5: memref<64x32xbf16, #tpu.memory_space<vmem>>, %arg6: memref<1x32xf32, #tpu.memory_space<vmem>>, %arg7: memref<1x32xf32, #tpu.memory_space<vmem>>, %arg8: memref<1x32xf32, #tpu.memory_space<vmem>>, %arg9: memref<16x32xf32, #tpu.memory_space<vmem>>, %arg10: memref<16x32xf32, #tpu.memory_space<vmem>>) attributes {dimension_semantics = [#tpu.dimension_semantics<parallel>, #tpu.dimension_semantics<arbitrary>], iteration_bounds = array<i64: 1, 1>, scalar_prefetch = 0 : i64, scratch_operands = 1 : i64, tpu.core_type = #tpu.core_type<tc>, window_params = [{transform_indices = @transform_0, window_bounds = array<i64: 16, 32>}, {transform_indices = @transform_1, window_bounds = array<i64: 32, 64>}, {transform_indices = @transform_2, window_bounds = array<i64: 1, 64>}, {transform_indices = @transform_3, window_bounds = array<i64: 64, 32>}, {pipeline_mode = #tpu.pipeline_mode<synchronous>, transform_indices = @transform_4, window_bounds = array<i64: 1, 32>}, {pipeline_mode = #tpu.pipeline_mode<synchronous>, transform_indices = @transform_5, window_bounds = array<i64: 1, 32>}, {pipeline_mode = #tpu.pipeline_mode<synchronous>, transform_indices = @transform_6, window_bounds = array<i64: 1, 32>}, {transform_indices = @transform_7, window_bounds = array<i64: 16, 32>}]} {
    %c0_i32 = arith.constant 0 : i32
    %0 = arith.cmpi eq, %arg1, %c0_i32 : i32
    %1 = arith.extui %0 : i1 to i32
    %c0_i32_0 = arith.constant 0 : i32
    %2 = arith.cmpi ne, %1, %c0_i32_0 : i32
    scf.if %2 {
      %cst_16 = arith.constant 0.000000e+00 : f32
      %21 = vector.broadcast %cst_16 : f32 to vector<16x32xf32>
      %c0_17 = arith.constant 0 : index
      %c0_18 = arith.constant 0 : index
      %22 = vector.load %arg10[%c0_17, %c0_18] : memref<16x32xf32, #tpu.memory_space<vmem>>, vector<16x32xf32>
      tpu.vector_store %arg10[%c0_17, %c0_18], %21 {strides = array<i32>} : memref<16x32xf32, #tpu.memory_space<vmem>>, vector<16x32xf32>,
    } else {
    }
    %c0 = arith.constant 0 : index
    %c0_1 = arith.constant 0 : index
    %3 = vector.load %arg2[%c0, %c0_1] : memref<16x32xf32, #tpu.memory_space<vmem>>, vector<16x32xf32>
    %4 = arith.truncf %3 : vector<16x32xf32> to vector<16x32xbf16>
    %c0_2 = arith.constant 0 : index
    %c0_3 = arith.constant 0 : index
    %5 = vector.load %arg3[%c0_2, %c0_3] : memref<32x64xbf16, #tpu.memory_space<vmem>>, vector<32x64xbf16>
    %cst = arith.constant dense<0.000000e+00> : vector<16x64xf32>
    %6 = tpu.matmul %4, %5, %cst {dimension_numbers = #tpu.dot_dimension_numbers<[1], [0], [0], [1], [0, 0, 1, 1], [], []>} : vector<16x32xbf16>, vector<32x64xbf16>, vector<16x64xf32> -> vector<16x64xf32>
    %c0_4 = arith.constant 0 : index
    %c0_5 = arith.constant 0 : index
    %7 = vector.load %arg4[%c0_4, %c0_5] : memref<1x64xf32, #tpu.memory_space<vmem>>, vector<1x64xf32>
    %8 = vector.broadcast %7 : vector<1x64xf32> to vector<16x64xf32>
    %9 = arith.addf %6, %8 : vector<16x64xf32>
    %cst_6 = arith.constant 0.000000e+00 : f32
    %10 = vector.broadcast %cst_6 : f32 to vector<16x64xf32>
    %11 = arith.maximumf %9, %10 : vector<16x64xf32>
    %c0_7 = arith.constant 0 : index
    %c0_8 = arith.constant 0 : index
    %12 = vector.load %arg10[%c0_7, %c0_8] : memref<16x32xf32, #tpu.memory_space<vmem>>, vector<16x32xf32>
    %13 = arith.truncf %11 : vector<16x64xf32> to vector<16x64xbf16>
    %c0_9 = arith.constant 0 : index
    %c0_10 = arith.constant 0 : index
    %14 = vector.load %arg5[%c0_9, %c0_10] : memref<64x32xbf16, #tpu.memory_space<vmem>>, vector<64x32xbf16>
    %cst_11 = arith.constant dense<0.000000e+00> : vector<16x32xf32>
    %15 = tpu.matmul %13, %14, %cst_11 {dimension_numbers = #tpu.dot_dimension_numbers<[1], [0], [0], [1], [0, 0, 1, 1], [], []>} : vector<16x64xbf16>, vector<64x32xbf16>, vector<16x32xf32> -> vector<16x32xf32>
    %16 = arith.addf %12, %15 : vector<16x32xf32>
    %c0_12 = arith.constant 0 : index
    %c0_13 = arith.constant 0 : index
    %17 = vector.load %arg10[%c0_12, %c0_13] : memref<16x32xf32, #tpu.memory_space<vmem>>, vector<16x32xf32>
    tpu.vector_store %arg10[%c0_12, %c0_13], %16 {strides = array<i32>} : memref<16x32xf32, #tpu.memory_space<vmem>>, vector<16x32xf32>,
    %c0_i32_14 = arith.constant 0 : i32
    %18 = arith.cmpi eq, %arg1, %c0_i32_14 : i32
    %19 = arith.extui %18 : i1 to i32
    %c0_i32_15 = arith.constant 0 : i32
    %20 = arith.cmpi ne, %19, %c0_i32_15 : i32
    scf.if %20 {
      %c0_16 = arith.constant 0 : index
      %c0_17 = arith.constant 0 : index
      %21 = vector.load %arg10[%c0_16, %c0_17] : memref<16x32xf32, #tpu.memory_space<vmem>>, vector<16x32xf32>
      %c0_18 = arith.constant 0 : index
      %c0_19 = arith.constant 0 : index
      %22 = vector.load %arg6[%c0_18, %c0_19] : memref<1x32xf32, #tpu.memory_space<vmem>>, vector<1x32xf32>
      %23 = vector.broadcast %22 : vector<1x32xf32> to vector<16x32xf32>
      %24 = arith.addf %21, %23 : vector<16x32xf32>
      %c0_20 = arith.constant 0 : index
      %c0_21 = arith.constant 0 : index
      %25 = vector.load %arg2[%c0_20, %c0_21] : memref<16x32xf32, #tpu.memory_space<vmem>>, vector<16x32xf32>
      %26 = arith.addf %24, %25 : vector<16x32xf32>
      %cst_22 = arith.constant dense<0.000000e+00> : vector<16xf32>
      %27 = vector.multi_reduction <add>, %26, %cst_22 [1] : vector<16x32xf32> to vector<16xf32>
      %28 = vector.shape_cast %27 : vector<16xf32> to vector<16x1xf32>
      %cst_23 = arith.constant 3.200000e+01 : f32
      %29 = vector.broadcast %cst_23 : f32 to vector<16x1xf32>
      %30 = arith.divf %28, %29 : vector<16x1xf32>
      %31 = vector.broadcast %30 : vector<16x1xf32> to vector<16x32xf32>
      %32 = arith.subf %26, %31 : vector<16x32xf32>
      %33 = vector.broadcast %30 : vector<16x1xf32> to vector<16x32xf32>
      %34 = arith.subf %26, %33 : vector<16x32xf32>
      %35 = arith.mulf %32, %34 : vector<16x32xf32>
      %cst_24 = arith.constant dense<0.000000e+00> : vector<16xf32>
      %36 = vector.multi_reduction <add>, %35, %cst_24 [1] : vector<16x32xf32> to vector<16xf32>
      %37 = vector.shape_cast %36 : vector<16xf32> to vector<16x1xf32>
      %cst_25 = arith.constant 3.200000e+01 : f32
      %38 = vector.broadcast %cst_25 : f32 to vector<16x1xf32>
      %39 = arith.divf %37, %38 : vector<16x1xf32>
      %40 = vector.broadcast %30 : vector<16x1xf32> to vector<16x32xf32>
      %41 = arith.subf %26, %40 : vector<16x32xf32>
      %cst_26 = arith.constant 9.99999974E-6 : f32
      %42 = vector.broadcast %cst_26 : f32 to vector<16x1xf32>
      %43 = arith.addf %39, %42 : vector<16x1xf32>
      %44 = math.rsqrt %43 : vector<16x1xf32>
      %45 = vector.broadcast %44 : vector<16x1xf32> to vector<16x32xf32>
      %46 = arith.mulf %41, %45 : vector<16x32xf32>
      %c0_27 = arith.constant 0 : index
      %c0_28 = arith.constant 0 : index
      %47 = vector.load %arg7[%c0_27, %c0_28] : memref<1x32xf32, #tpu.memory_space<vmem>>, vector<1x32xf32>
      %48 = vector.broadcast %47 : vector<1x32xf32> to vector<16x32xf32>
      %49 = arith.mulf %46, %48 : vector<16x32xf32>
      %c0_29 = arith.constant 0 : index
      %c0_30 = arith.constant 0 : index
      %50 = vector.load %arg8[%c0_29, %c0_30] : memref<1x32xf32, #tpu.memory_space<vmem>>, vector<1x32xf32>
      %51 = vector.broadcast %50 : vector<1x32xf32> to vector<16x32xf32>
      %52 = arith.addf %49, %51 : vector<16x32xf32>
      %c0_31 = arith.constant 0 : index
      %c0_32 = arith.constant 0 : index
      %53 = vector.load %arg9[%c0_31, %c0_32] : memref<16x32xf32, #tpu.memory_space<vmem>>, vector<16x32xf32>
      tpu.vector_store %arg9[%c0_31, %c0_32], %52 {strides = array<i32>} : memref<16x32xf32, #tpu.memory_space<vmem>>, vector<16x32xf32>,
    } else {
    }
    return
  }
  func.func @transform_0(%arg0: i32, %arg1: i32) -> (i32, i32) {
    %c0_i32 = arith.constant 0 : i32
    %c0_i32_0 = arith.constant 0 : i32
    return %arg0, %c0_i32 : i32, i32
  }
  func.func @transform_1(%arg0: i32, %arg1: i32) -> (i32, i32) {
    %c0_i32 = arith.constant 0 : i32
    %c0_i32_0 = arith.constant 0 : i32
    return %c0_i32, %arg1 : i32, i32
  }
  func.func @transform_2(%arg0: i32, %arg1: i32) -> (i32, i32) {
    %c0_i32 = arith.constant 0 : i32
    %c0_i32_0 = arith.constant 0 : i32
    return %c0_i32, %arg1 : i32, i32
  }
  func.func @transform_3(%arg0: i32, %arg1: i32) -> (i32, i32) {
    %c0_i32 = arith.constant 0 : i32
    %c0_i32_0 = arith.constant 0 : i32
    return %arg1, %c0_i32 : i32, i32
  }
  func.func @transform_4(%arg0: i32, %arg1: i32) -> (i32, i32) {
    %c0_i32 = arith.constant 0 : i32
    %c0_i32_0 = arith.constant 0 : i32
    %c0_i32_1 = arith.constant 0 : i32
    return %c0_i32, %c0_i32_0 : i32, i32
  }
  func.func @transform_5(%arg0: i32, %arg1: i32) -> (i32, i32) {
    %c0_i32 = arith.constant 0 : i32
    %c0_i32_0 = arith.constant 0 : i32
    %c0_i32_1 = arith.constant 0 : i32
    return %c0_i32, %c0_i32_0 : i32, i32
  }
  func.func @transform_6(%arg0: i32, %arg1: i32) -> (i32, i32) {
    %c0_i32 = arith.constant 0 : i32
    %c0_i32_0 = arith.constant 0 : i32
    %c0_i32_1 = arith.constant 0 : i32
    return %c0_i32, %c0_i32_0 : i32, i32
  }
  func.func @transform_7(%arg0: i32, %arg1: i32) -> (i32, i32) {
    %c0_i32 = arith.constant 0 : i32
    %c0_i32_0 = arith.constant 0 : i32
    return %arg0, %c0_i32 : i32, i32
  }
}

</mosaic_0001>

<bundles_post_ra>
// kernel: positionwise_ffn.1
= control target key start
LH: loop header
LB: loop body
LE: loop exit
PB: predicated region body
PF: predicated region fallthrough
CT: control target
= control target key end

     0   :  { %s401_s0 = inlined_call_operand.vmem [shape: f32[16,32], index: 0, kind: input, shape index: {}]   ;;  %s402_s1 = inlined_call_operand.vmem [shape: bf16[32,64], index: 1, kind: input, shape index: {}]   ;;  %s403_s2 = inlined_call_operand.vmem [shape: f32[1,64], index: 2, kind: input, shape index: {}]   ;;  %s404_s3 = inlined_call_operand.vmem [shape: bf16[64,32], index: 3, kind: input, shape index: {}]   ;;  %s405_s4 = inlined_call_operand.vmem [shape: f32[1,32], index: 4, kind: input, shape index: {}]   ;;  %s406_s5 = inlined_call_operand.vmem [shape: f32[1,32], index: 5, kind: input, shape index: {}]   ;;  %s407_s6 = inlined_call_operand.vmem [shape: f32[1,32], index: 6, kind: input, shape index: {}]   ;;  %s408_s7 = inlined_call_operand.hbm [shape: f32[16,32], index: 7, kind: output, shape index: {}]  }
   0x1   :  { %v260_v0 = vld [vmem:[%s402_s1 + $0x8] sm:$0xff]  ;;  %v259_v1 = vld [vmem:[%s402_s1] sm:$0xff] }
   0x2   :  { %v35_v2 = vld [vmem:[%s401_s0] sm:$0xff]  ;;  %v36_v3 = vld [vmem:[%s401_s0 + $0x8] sm:$0xff]  ;;  %68 = vmatpush.bf16.msra.mxu0 %v260_v0 }
   0x3   :  { %12 = vsyncpa [#allocation4], 0  ;;  %v37_v4 = vpack.c.bf16 %v36_v3, %v35_v2  ;;  %vm32_vm0 = vcmask 261120   ;;  %v264_v5 = vld [vmem:[%s404_s3 + $0x18] sm:$0xff]  ;;  %v263_v6 = vld [vmem:[%s404_s3 + $0x10] sm:$0xff]  ;;  %v306_v9 = vmov 0.0  }
   0x4   :  { %121 = vmatpush.bf16.msra.mxu1 %v264_v5  ;;  %v262_v7 = vld [vmem:[%s404_s3 + $0x8] sm:$0xff]  ;;  %v261_v8 = vld [vmem:[%s404_s3] sm:$0xff]  ;;  %33 = vst.msk [vmem:[#allocation2] sm:$0xff] %vm32_vm0, %v306_v9  ;;  %vm113_vm1 = vcmask 523264   ;;  %v307_v33 = vmov 32.0   ;;  %s221_s23 = sshll.u32 %s408_s7, 4  ;;  %s222_s23 = int_to_ptr.hbm [resolvable:$true] %s221_s23 }
   0x5   :  { %34 = vst.msk [vmem:[#allocation2 + $0x8] sm:$0xff] %vm32_vm0, %v306_v9  ;;  %v270_v11 = vld [vmem:[%s403_s2] ss:$0 sm:$0xff]  ;;  %274 = vrcp.f32 %v307_v33  ;;  %s310_s24 = smov 8  }
   0x6   :  { %69 = vmatpush.bf16.msra.mxu0 %v259_v1  ;;  %v271_v22 = vld [vmem:[%s405_s4] ss:$0 sm:$0xff] }
   0x7   :  { %v272_v0 = vld [vmem:[%s406_s5] ss:$0 sm:$0xff]  ;;  %s308_s5 = smov [#allocation3]  }
   0x8   :  { %122 = vmatpush.bf16.msra.mxu1 %v263_v6  ;;  %s219_s20 = sshll.u32 %s308_s5, 4  ;;  %s220_s20 = int_to_ptr.vmem [resolvable:$true] %s219_s20 }
   0x9   :  { %241 = vmatmul.msk.bf16.vlgmr.msra.gmra.mxu0 %vm32_vm0, %v37_v4  ;;  %v273_v4 = vld [vmem:[%s407_s6] ss:$0 sm:$0xff]  ;;  %s309_s6 = smov 128  }
   0xb   :  { %v78_v18 = vld [vmem:[#allocation2] sm:$0xff]  ;;  %v275_v34 = vpop.eup %274 }
   0xc   :  { %123 = vmatpush.bf16.msra.mxu1 %v262_v7  ;;  %v79_v21 = vld [vmem:[#allocation2 + $0x8] sm:$0xff]  ;;  %v157_v35 = vmul.f32 32.0, %v275_v34  ;;  %vm161_vm2 = vweird.f32 %v275_v34 }
   0xe   :  { %v158_v36 = vsub.f32 1.0, %v157_v35 }
  0x10   :  { %124 = vmatpush.bf16.msra.mxu1 %v261_v8  ;;  %v159_v37 = vmul.f32 %v275_v34, %v158_v36 }
  0x12   :  { %v160_v38 = vadd.f32 %v275_v34, %v159_v37 }
  0x14   :  { %v162_v39 = vsel %vm161_vm2, %v275_v34, %v160_v38 }
  0x86   :  { %v71_v10 = vpop.f32.mrf.mxu0 }
  0x87   :  { %v72_v12 = vadd.f32 %v270_v11, %v71_v10 }
  0x89   :  { %v76_v15 = vmax.f32 %v72_v12, 0.0 }
  0x8e   :  { %v73_v13 = vpop.f32.mrf.mxu0 }
  0x8f   :  { %v74_v14 = vadd.f32 %v270_v11, %v73_v13 }
  0x91   :  { %v77_v16 = vmax.f32 %v74_v14, 0.0 }
  0x93   :  { %v80_v17 = vpack.c.bf16 %v77_v16, %v76_v15 }
  0x95   :  { %258 = vmatmul.msk.bf16.vlgmr.msra.gmra.mxu1 %vm113_vm1, %v80_v17 }
 0x112   :  { %v126_v19 = vpop.f32.mrf.mxu1 }
 0x113   :  { %v131_v20 = vadd.f32 %v126_v19, %v78_v18 }
 0x115   :  { %133 = vst.msk [vmem:[#allocation2] sm:$0xff] %vm32_vm0, %v131_v20 }
 0x11a   :  { %v128_v23 = vpop.f32.mrf.mxu1 }
 0x11b   :  { %v132_v24 = vadd.f32 %v128_v23, %v79_v21 }
 0x11c   :  { %v138_v25 = vld [vmem:[#allocation2] sm:$0xff] }
 0x11d   :  { %134 = vst.msk [vmem:[#allocation2 + $0x8] sm:$0xff] %vm32_vm0, %v132_v24  ;;  %v144_v26 = vadd.f32 %v271_v22, %v138_v25 }
 0x11f   :  { %v148_v27 = vadd.f32 %v144_v26, %v35_v2 }
 0x121   :  { %v150_v28 = vsel %vm32_vm0, %v148_v27, 0.0 }
 0x122   :  { %151 = vadd.xlane.f32.xlu0 %v150_v28 }
 0x124   :  { %v139_v29 = vld [vmem:[#allocation2 + $0x8] sm:$0xff] }
 0x125   :  { %v145_v30 = vadd.f32 %v271_v22, %v139_v29 }
 0x127   :  { %v149_v31 = vadd.f32 %v145_v30, %v36_v3 }
 0x129   :  { %v153_v32 = vsel %vm32_vm0, %v149_v31, 0.0 }
 0x12a   :  { %154 = vadd.xlane.f32.xlu0 %v153_v32 }
 0x195   :  { %v152_v40 = vpop.xlane.xlu0 %151 }
 0x196   :  { %v163_v41 = vmul.f32 %v162_v39, %v152_v40 }
 0x198   :  { %v165_v42 = vsub.f32 %v148_v27, %v163_v41 }
 0x19a   :  { %v167_v43 = vmul.f32 %v165_v42, %v165_v42 }
 0x19c   :  { %v169_v44 = vsel %vm32_vm0, %v167_v43, 0.0 }
 0x19d   :  { %170 = vadd.xlane.f32.xlu1 %v169_v44  ;;  %v155_v45 = vpop.xlane.xlu0 %154 }
 0x19e   :  { %v164_v46 = vmul.f32 %v162_v39, %v155_v45 }
 0x1a0   :  { %v166_v47 = vsub.f32 %v149_v31, %v164_v46 }
 0x1a2   :  { %v168_v48 = vmul.f32 %v166_v47, %v166_v47 }
 0x1a4   :  { %v172_v49 = vsel %vm32_vm0, %v168_v48, 0.0 }
 0x1a5   :  { %173 = vadd.xlane.f32.xlu1 %v172_v49 }
 0x210   :  { %v171_v50 = vpop.xlane.xlu1 %170 }
 0x211   :  { %v175_v51 = vmul.f32 %v171_v50, %v162_v39 }
 0x213   :  { %v177_v52 = vadd.f32 1e-05, %v175_v51 }
 0x215   :  { %276 = vrsqrt.f32 %v177_v52  ;;  %vm185_vm4 = vweird.f32 %v177_v52 }
 0x218   :  { %v174_v53 = vpop.xlane.xlu1 %173 }
 0x219   :  { %v176_v54 = vmul.f32 %v174_v53, %v162_v39 }
 0x21b   :  { %v277_v55 = vpop.eup %276  ;;  %v178_v56 = vadd.f32 1e-05, %v176_v54 }
 0x21c   :  { %v180_v57 = vmul.f32 %v277_v55, %v177_v52  ;;  %vm186_vm3 = vweird.f32 %v277_v55 }
 0x21d   :  { %278 = vrsqrt.f32 %v178_v56  ;;  %vm187_vm5 = vmor %vm185_vm4, %vm186_vm3  ;;  %vm195_vm7 = vweird.f32 %v178_v56 }
 0x21e   :  { %v181_v58 = vmul.f32 %v277_v55, %v180_v57 }
 0x220   :  { %v182_v59 = vmul.f32 0.5, %v181_v58 }
 0x222   :  { %v183_v60 = vsub.f32 1.5, %v182_v59 }
 0x223   :  { %v279_v61 = vpop.eup %278 }
 0x224   :  { %v184_v62 = vmul.f32 %v277_v55, %v183_v60  ;;  %v190_v63 = vmul.f32 %v279_v61, %v178_v56  ;;  %vm196_vm6 = vweird.f32 %v279_v61 }
 0x225   :  { %vm197_vm8 = vmor %vm195_vm7, %vm196_vm6 }
 0x226   :  { %v188_v1 = vsel %vm187_vm5, %v277_v55, %v184_v62  ;;  %v191_v2 = vmul.f32 %v279_v61, %v190_v63 }
 0x227   :  { %v199_v3 = vmul.f32 %v188_v1, %v165_v42 }
 0x228   :  { %v192_v5 = vmul.f32 0.5, %v191_v2 }
 0x229   :  { %v205_v6 = vmul.f32 %v272_v0, %v199_v3 }
 0x22a   :  { %v193_v7 = vsub.f32 1.5, %v192_v5 }
 0x22b   :  { %v211_v8 = vadd.f32 %v273_v4, %v205_v6 }
 0x22c   :  { %v194_v9 = vmul.f32 %v279_v61, %v193_v7 }
 0x22d   :  { %213 = vst.msk [vmem:[#allocation3] sm:$0xff] %vm32_vm0, %v211_v8 }
 0x22e   :  { %v198_v10 = vsel %vm197_vm8, %v279_v61, %v194_v9 }
 0x22f   :  { %v200_v11 = vmul.f32 %v198_v10, %v166_v47 }
 0x231   :  { %v206_v12 = vmul.f32 %v272_v0, %v200_v11 }
 0x233   :  { %v212_v13 = vadd.f32 %v273_v4, %v206_v12 }
 0x235   :  { %214 = vst.msk [vmem:[#allocation3 + $0x8] sm:$0xff] %vm32_vm0, %v212_v13 }
 0x236   :  { %227 = dma.vmem_to_hbm [thread:$0]  %s220_s20, 256, %s222_s23, [#allocation4], %s309_s6, %s309_s6, %s310_s24  }
 0x237   :  { %304 = dma.done.wait [#allocation4], 256  }
 0x238   :  { %305 = vsyncadd [#allocation4], 4294967040 }
 0x239   :  { %232 = vsyncpa [#allocation4], 1 }

</bundles_post_ra>
